<compile_context>
chip_gen: v7x
topology: tpu7x:2x2x1
jax: 0.10.0
libtpu: 0.0.40
codegen_flags: <defaults>
</compile_context>

<pallas_src>
import jax
import jax.numpy as jnp
import numpy as np
from jax.experimental import pallas as pl
from jax.experimental.pallas import tpu as pltpu

# Problem sizes (small, consistent with the NCHW conv module)
B, CIN, H, W = 2, 4, 16, 16
COUT = 8
KH = KW = 3
HO = (H + 2 - KH) // 2 + 1     # conv output height (stride 2, pad 1) = 8
WO = (W + 2 - KW) // 2 + 1     # conv output width                     = 8

ROWS_IN = B * H                # 32  : kernel input rows   (b, h)
LANES_IN = W * CIN             # 64  : kernel input lanes  (w, ci)
ROWS_CONV = B * HO             # 16  : conv rows           (b, ho)
LANES_CONV = COUT * WO         # 64  : conv lanes          (co, wo)  channel-major
LANES_OUT = COUT * W           # 128 : output lanes        (co, w)   lane dense


def bilinear_matrix_np(out_size, in_size):
    """Resampling matrix M (out,in): y = M @ x. PyTorch bilinear, align_corners=False."""
    if out_size == in_size:
        return np.eye(out_size, dtype=np.float32)
    scale = in_size / out_size
    dst = np.arange(out_size, dtype=np.float64)
    src = np.maximum((dst + 0.5) * scale - 0.5, 0.0)
    i0 = np.clip(np.floor(src).astype(np.int64), 0, in_size - 1)
    i1 = np.minimum(i0 + 1, in_size - 1)
    w1 = (src - i0).astype(np.float32)
    w0 = 1.0 - w1
    m = np.zeros((out_size, in_size), dtype=np.float32)
    m[np.arange(out_size), i0] += w0
    m[np.arange(out_size), i1] += w1
    return m


def keepres_kernel(x_ref, s_ref, c_ref, b_ref, bk_ref, a_ref, o_ref):
    # x_ref : (ROWS_IN, LANES_IN)        raw NHWC-flattened activations, bf16
    # s_ref : (KH, ROWS_CONV, ROWS_IN)   0/1 row-select (stride-2 + pad baked in), bf16
    # c_ref : (KH, LANES_IN, LANES_CONV) per-kh conv weights (kw/pad/stride baked in), bf16
    # b_ref : (1, LANES_CONV)            bias repeated over WO (channel-major), f32
    # bk_ref: (LANES_CONV, LANES_OUT)    kron(I_COUT, b_col).T column resize, f32
    # o_ref : (ROWS_IN, LANES_OUT)       lane-dense output, rows (b,h), lanes (co,w), f32
    x = x_ref[...]
    acc = jnp.zeros((ROWS_CONV, LANES_CONV), jnp.float32)
    for kh in range(KH):                                                   # 3 taps, unrolled
        # Row gather on the MXU (values are exact copies -> bf16 recast is exact).
        rows = jnp.dot(s_ref[kh], x, preferred_element_type=jnp.float32)
        acc += jnp.dot(rows.astype(jnp.bfloat16), c_ref[kh],
                       preferred_element_type=jnp.float32)                 # conv tap
    y = jnp.maximum(acc + b_ref[...], 0.0)                                 # bias + ReLU (f32)
    y = jnp.dot(y, bk_ref[...], preferred_element_type=jnp.float32)        # column resize first
    y = jnp.dot(a_ref[...], y, preferred_element_type=jnp.float32)         # then row resize
    o_ref[...] = y


def make_keepres_params(w_oihw, bias):
    """Precompute all weight-derived kernel operands once (outside the hot path)."""
    w = np.transpose(np.asarray(w_oihw, dtype=np.float32), (2, 3, 1, 0))   # (KH,KW,CIN,COUT)
    bias = np.asarray(bias, dtype=np.float32)

    # S_kh[ho, h] = 1  iff  h == 2*ho + kh - 1  (out-of-range rows -> zero padding)
    s = np.zeros((KH, HO, H), dtype=np.float32)
    for kh in range(KH):
        for ho in range(HO):
            h = 2 * ho + kh - 1
            if 0 <= h < H:
                s[kh, ho, h] = 1.0
    s_all = np.stack([np.kron(np.eye(B, dtype=np.float32), s[kh]) for kh in range(KH)])

    # C_kh[w*CIN+ci, co*WO+wo] = w[kh,kw,ci,co]  with  w = 2*wo + kw - 1
    c_all = np.zeros((KH, LANES_IN, LANES_CONV), dtype=np.float32)
    for kh in range(KH):
        for kw in range(KW):
            for wo in range(WO):
                w_col = 2 * wo + kw - 1
                if 0 <= w_col < W:
                    c_all[kh, w_col * CIN:(w_col + 1) * CIN, wo::WO] = w[kh, kw]
    # TODO(synk): at production CIN/COUT these C_kh are still ~80% zeros; gather the
    # taps in VMEM (K = KH*KW*CIN, WO folded into M) before scaling channel counts.

    bias_row = np.repeat(bias, WO)[None, :]                                # (1, LANES_CONV)

    b_col = bilinear_matrix_np(W, WO)                                      # (W, WO)
    bk = np.kron(np.eye(COUT, dtype=np.float32), b_col).T                  # (LANES_CONV, LANES_OUT)
    a_row = bilinear_matrix_np(H, HO)                                      # (H, HO)
    a_mat = np.kron(np.eye(B, dtype=np.float32), a_row)                    # (ROWS_IN, ROWS_CONV)
    # TODO(synk): a_mat grows O(B^2) and bk O(COUT^2); before scaling B/COUT, apply the
    # row resize per batch block and the column resize per channel (fold them into M).

    return dict(
        s=jnp.asarray(s_all, dtype=jnp.bfloat16),   # 0/1 -> exact in bf16
        c=jnp.asarray(c_all, dtype=jnp.bfloat16),
        bias=jnp.asarray(bias_row, dtype=jnp.float32),
        bk=jnp.asarray(bk, dtype=jnp.float32),      # resize weights kept in f32 (accuracy)
        a=jnp.asarray(a_mat, dtype=jnp.float32),
    )


# Static cost hint (helps XLA schedule surrounding ops; the kernel itself is tiny).
_FLOPS = (2 * KH * ROWS_CONV * ROWS_IN * LANES_IN          # row-select matmuls
          + 2 * KH * ROWS_CONV * LANES_IN * LANES_CONV     # conv-tap matmuls
          + 2 * ROWS_CONV * LANES_CONV * LANES_OUT         # column resize
          + 2 * ROWS_IN * ROWS_CONV * LANES_OUT)           # row resize
_BYTES = (ROWS_IN * LANES_IN * 2 + KH * ROWS_CONV * ROWS_IN * 2
          + KH * LANES_IN * LANES_CONV * 2 + LANES_CONV * 4
          + LANES_CONV * LANES_OUT * 4 + ROWS_IN * ROWS_CONV * 4
          + ROWS_IN * LANES_OUT * 4)


def keepres_forward(x_nchw, params):
    # NCHW -> (B*H, W*CIN) bf16.  These are the only surrounding ops; the producer
    # is marked fusible into the pallas_call via allow_input_fusion.
    x_flat = (jnp.transpose(x_nchw, (0, 2, 3, 1))
              .reshape(ROWS_IN, LANES_IN).astype(jnp.bfloat16))
    out = pl.pallas_call(
        keepres_kernel,
        out_shape=jax.ShapeDtypeStruct((ROWS_IN, LANES_OUT), jnp.float32),
        # No grid: batch folded into M, single invocation, all operands whole in VMEM
        # (~90 KiB resident -> far below every generation's VMEM limit).
        compiler_params=pltpu.CompilerParams(
            allow_input_fusion=[True, False, False, False, False, False]),
        cost_estimate=pl.CostEstimate(flops=_FLOPS, transcendentals=0,
                                      bytes_accessed=_BYTES),
    )(x_flat, params["s"], params["c"], params["bias"], params["bk"], params["a"])
    # Lanes are (COUT, W): only a minor-dim-preserving permutation remains.
    # TODO(synk): return (B, H, COUT, W) / NHWC directly if the caller allows,
    # dropping this op as well.
    return jnp.transpose(out.reshape(B, H, COUT, W), (0, 2, 1, 3))


def keepres_reference(x_nchw, w_oihw, bias):
    """Pure-JAX f32 reference (lax.conv + the same bilinear matrices).

    NOTE: reuses bilinear_matrix_np, so this validates internal consistency;
    add a torch-generated golden if exact F.interpolate parity must be certified.
    """
    y = jax.lax.conv_general_dilated(
        x_nchw.astype(jnp.float32), w_oihw.astype(jnp.float32),
        window_strides=(2, 2), padding=((1, 1), (1, 1)),
        dimension_numbers=("NCHW", "OIHW", "NCHW"))
    y = jnp.maximum(y + bias[None, :, None, None], 0.0)
    b_col = jnp.asarray(bilinear_matrix_np(W, WO))
    a_row = jnp.asarray(bilinear_matrix_np(H, HO))
    y = jnp.einsum("Ww,bchw->bchW", b_col, y)
    y = jnp.einsum("Hh,bchw->bcHw", a_row, y)
    return y


if __name__ == "__main__":
    key = jax.random.PRNGKey(0)
    kx, kw, kb = jax.random.split(key, 3)
    x = jax.random.normal(kx, (B, CIN, H, W), dtype=jnp.float32)
    fan_in = CIN * KH * KW
    bound = 1.0 / (fan_in ** 0.5)
    w = jax.random.uniform(kw, (COUT, CIN, KH, KW), dtype=jnp.float32,
                           minval=-bound, maxval=bound)
    b = jax.random.uniform(kb, (COUT,), dtype=jnp.float32,
                           minval=-bound, maxval=bound)

    params = make_keepres_params(w, b)          # weight-derived operands, built once
    fwd = jax.jit(keepres_forward)

    out = jax.block_until_ready(fwd(x, params))
    assert out.shape == (B, COUT, H, W), out.shape

    ref = keepres_reference(x, w, b)
    max_err = float(jnp.max(jnp.abs(out - ref)))
    # bf16 conv operands with f32 accumulation; resize matmuls in f32.
    assert jnp.allclose(out, ref, atol=3e-2, rtol=3e-2), max_err

    print("KERNEL_OK")
</pallas_src>

<mosaic_0001>
module attributes {stable_mosaic.version = 11 : i64} {
  func.func @keepres_kernel(%arg0: memref<32x64xbf16, #tpu.memory_space<vmem>>, %arg1: memref<3x16x32xbf16, #tpu.memory_space<vmem>>, %arg2: memref<3x64x64xbf16, #tpu.memory_space<vmem>>, %arg3: memref<1x64xf32, #tpu.memory_space<vmem>>, %arg4: memref<64x128xf32, #tpu.memory_space<vmem>>, %arg5: memref<32x16xf32, #tpu.memory_space<vmem>>, %arg6: memref<32x128xf32, #tpu.memory_space<vmem>>) attributes {dimension_semantics = [], scalar_prefetch = 0 : i64, scratch_operands = 0 : i64, tpu.core_type = #tpu.core_type<tc>} {
    %c0 = arith.constant 0 : index
    %c0_0 = arith.constant 0 : index
    %0 = vector.load %arg0[%c0, %c0_0] : memref<32x64xbf16, #tpu.memory_space<vmem>>, vector<32x64xbf16>
    %cst = arith.constant 0.000000e+00 : f32
    %1 = vector.broadcast %cst : f32 to vector<16x64xf32>
    %c0_1 = arith.constant 0 : index
    %c0_2 = arith.constant 0 : index
    %c0_3 = arith.constant 0 : index
    %2 = vector.load %arg1[%c0_1, %c0_2, %c0_3] : memref<3x16x32xbf16, #tpu.memory_space<vmem>>, vector<1x16x32xbf16>
    %3 = vector.shape_cast %2 : vector<1x16x32xbf16> to vector<16x32xbf16>
    %cst_4 = arith.constant dense<0.000000e+00> : vector<16x64xf32>
    %4 = tpu.matmul %3, %0, %cst_4 {dimension_numbers = #tpu.dot_dimension_numbers<[1], [0], [0], [1], [0, 0, 1, 1], [], []>} : vector<16x32xbf16>, vector<32x64xbf16>, vector<16x64xf32> -> vector<16x64xf32>
    %5 = arith.truncf %4 : vector<16x64xf32> to vector<16x64xbf16>
    %c0_5 = arith.constant 0 : index
    %c0_6 = arith.constant 0 : index
    %c0_7 = arith.constant 0 : index
    %6 = vector.load %arg2[%c0_5, %c0_6, %c0_7] : memref<3x64x64xbf16, #tpu.memory_space<vmem>>, vector<1x64x64xbf16>
    %7 = vector.shape_cast %6 : vector<1x64x64xbf16> to vector<64x64xbf16>
    %cst_8 = arith.constant dense<0.000000e+00> : vector<16x64xf32>
    %8 = tpu.matmul %5, %7, %cst_8 {dimension_numbers = #tpu.dot_dimension_numbers<[1], [0], [0], [1], [0, 0, 1, 1], [], []>} : vector<16x64xbf16>, vector<64x64xbf16>, vector<16x64xf32> -> vector<16x64xf32>
    %9 = arith.addf %1, %8 : vector<16x64xf32>
    %c1 = arith.constant 1 : index
    %c0_9 = arith.constant 0 : index
    %c0_10 = arith.constant 0 : index
    %10 = vector.load %arg1[%c1, %c0_9, %c0_10] : memref<3x16x32xbf16, #tpu.memory_space<vmem>>, vector<1x16x32xbf16>
    %11 = vector.shape_cast %10 : vector<1x16x32xbf16> to vector<16x32xbf16>
    %cst_11 = arith.constant dense<0.000000e+00> : vector<16x64xf32>
    %12 = tpu.matmul %11, %0, %cst_11 {dimension_numbers = #tpu.dot_dimension_numbers<[1], [0], [0], [1], [0, 0, 1, 1], [], []>} : vector<16x32xbf16>, vector<32x64xbf16>, vector<16x64xf32> -> vector<16x64xf32>
    %13 = arith.truncf %12 : vector<16x64xf32> to vector<16x64xbf16>
    %c1_12 = arith.constant 1 : index
    %c0_13 = arith.constant 0 : index
    %c0_14 = arith.constant 0 : index
    %14 = vector.load %arg2[%c1_12, %c0_13, %c0_14] : memref<3x64x64xbf16, #tpu.memory_space<vmem>>, vector<1x64x64xbf16>
    %15 = vector.shape_cast %14 : vector<1x64x64xbf16> to vector<64x64xbf16>
    %cst_15 = arith.constant dense<0.000000e+00> : vector<16x64xf32>
    %16 = tpu.matmul %13, %15, %cst_15 {dimension_numbers = #tpu.dot_dimension_numbers<[1], [0], [0], [1], [0, 0, 1, 1], [], []>} : vector<16x64xbf16>, vector<64x64xbf16>, vector<16x64xf32> -> vector<16x64xf32>
    %17 = arith.addf %9, %16 : vector<16x64xf32>
    %c2 = arith.constant 2 : index
    %c0_16 = arith.constant 0 : index
    %c0_17 = arith.constant 0 : index
    %18 = vector.load %arg1[%c2, %c0_16, %c0_17] : memref<3x16x32xbf16, #tpu.memory_space<vmem>>, vector<1x16x32xbf16>
    %19 = vector.shape_cast %18 : vector<1x16x32xbf16> to vector<16x32xbf16>
    %cst_18 = arith.constant dense<0.000000e+00> : vector<16x64xf32>
    %20 = tpu.matmul %19, %0, %cst_18 {dimension_numbers = #tpu.dot_dimension_numbers<[1], [0], [0], [1], [0, 0, 1, 1], [], []>} : vector<16x32xbf16>, vector<32x64xbf16>, vector<16x64xf32> -> vector<16x64xf32>
    %21 = arith.truncf %20 : vector<16x64xf32> to vector<16x64xbf16>
    %c2_19 = arith.constant 2 : index
    %c0_20 = arith.constant 0 : index
    %c0_21 = arith.constant 0 : index
    %22 = vector.load %arg2[%c2_19, %c0_20, %c0_21] : memref<3x64x64xbf16, #tpu.memory_space<vmem>>, vector<1x64x64xbf16>
    %23 = vector.shape_cast %22 : vector<1x64x64xbf16> to vector<64x64xbf16>
    %cst_22 = arith.constant dense<0.000000e+00> : vector<16x64xf32>
    %24 = tpu.matmul %21, %23, %cst_22 {dimension_numbers = #tpu.dot_dimension_numbers<[1], [0], [0], [1], [0, 0, 1, 1], [], []>} : vector<16x64xbf16>, vector<64x64xbf16>, vector<16x64xf32> -> vector<16x64xf32>
    %25 = arith.addf %17, %24 : vector<16x64xf32>
    %c0_23 = arith.constant 0 : index
    %c0_24 = arith.constant 0 : index
    %26 = vector.load %arg3[%c0_23, %c0_24] : memref<1x64xf32, #tpu.memory_space<vmem>>, vector<1x64xf32>
    %27 = vector.broadcast %26 : vector<1x64xf32> to vector<16x64xf32>
    %28 = arith.addf %25, %27 : vector<16x64xf32>
    %cst_25 = arith.constant 0.000000e+00 : f32
    %29 = vector.broadcast %cst_25 : f32 to vector<16x64xf32>
    %30 = arith.maximumf %28, %29 : vector<16x64xf32>
    %c0_26 = arith.constant 0 : index
    %c0_27 = arith.constant 0 : index
    %31 = vector.load %arg4[%c0_26, %c0_27] : memref<64x128xf32, #tpu.memory_space<vmem>>, vector<64x128xf32>
    %cst_28 = arith.constant dense<0.000000e+00> : vector<16x128xf32>
    %32 = tpu.matmul %30, %31, %cst_28 {dimension_numbers = #tpu.dot_dimension_numbers<[1], [0], [0], [1], [0, 0, 1, 1], [], []>} : vector<16x64xf32>, vector<64x128xf32>, vector<16x128xf32> -> vector<16x128xf32>
    %c0_29 = arith.constant 0 : index
    %c0_30 = arith.constant 0 : index
    %33 = vector.load %arg5[%c0_29, %c0_30] : memref<32x16xf32, #tpu.memory_space<vmem>>, vector<32x16xf32>
    %cst_31 = arith.constant dense<0.000000e+00> : vector<32x128xf32>
    %34 = tpu.matmul %33, %32, %cst_31 {dimension_numbers = #tpu.dot_dimension_numbers<[1], [0], [0], [1], [0, 0, 1, 1], [], []>} : vector<32x16xf32>, vector<16x128xf32>, vector<32x128xf32> -> vector<32x128xf32>
    %c0_32 = arith.constant 0 : index
    %c0_33 = arith.constant 0 : index
    %35 = vector.load %arg6[%c0_32, %c0_33] : memref<32x128xf32, #tpu.memory_space<vmem>>, vector<32x128xf32>
    tpu.vector_store %arg6[%c0_32, %c0_33], %34 {strides = array<i32>} : memref<32x128xf32, #tpu.memory_space<vmem>>, vector<32x128xf32>,
    return
  }
}

</mosaic_0001>

<bundles_post_ra>
// kernel: keepres_forward.1
= control target key start
LH: loop header
LB: loop body
LE: loop exit
PB: predicated region body
PF: predicated region fallthrough
CT: control target
= control target key end

     0   :  { %v860_v0 = vmov 0.0   ;;  %vm861_vm0 = vmmov 0   ;;  %vm47_vm1 = vcmask 261120   ;;  %vm187_vm2 = vcmask 523264   ;;  %s1037_s0 = inlined_call_operand.vmem [shape: bf16[32,64], index: 0, kind: input, shape index: {}]   ;;  %s1038_s1 = inlined_call_operand.vmem [shape: bf16[3,16,32], index: 1, kind: input, shape index: {}]   ;;  %s1039_s2 = inlined_call_operand.vmem [shape: bf16[3,64,64], index: 2, kind: input, shape index: {}]   ;;  %s1040_s4 = inlined_call_operand.vmem [shape: f32[64,128], index: 4, kind: input, shape index: {}]   ;;  %s1041_s3 = inlined_call_operand.vmem [shape: f32[1,64], index: 3, kind: input, shape index: {}]   ;;  %s1042_s5 = inlined_call_operand.vmem [shape: f32[32,16], index: 5, kind: input, shape index: {}]   ;;  %s1043_s6 = inlined_call_operand.vmem [shape: f32[32,128], index: 6, kind: output, shape index: {}]  }
   0x1   :  { %732 = vmatprep.subr.bf16.mxu0 %v860_v0  ;;  %740 = vmatprep.subr.bf16.mxu1 %v860_v0  ;;  %v843_v1 = vld [vmem:[%s1037_s0] sm:$0xff]   ;;  %v844_v2 = vld [vmem:[%s1037_s0 + $0x8] sm:$0xff]   ;;  %v851_v9 = vld [vmem:[%s1039_s2 + $0x30] sm:$0xff]   ;;  %vm536_vm3 = vcmask 130048  }
   0x2   :  { %736 = vmatprep.mubr.msk.bf16.mxu0 %vm861_vm0, %v860_v0  ;;  %744 = vmatprep.mubr.msk.bf16.mxu1 %vm861_vm0, %v860_v0  ;;  %v845_v3 = vld [vmem:[%s1038_s1] sm:$0xff]   ;;  %v846_v4 = vld [vmem:[%s1038_s1 + $0x8] sm:$0xff]   ;;  %v852_v10 = vld [vmem:[%s1039_s2 + $0x10] sm:$0xff]  }
   0x3   :  { %733 = vmatpush3.bf16.msra.mxu0 %v843_v1  ;;  %741 = vmatpush3.bf16.msra.mxu1 %v843_v1  ;;  %v847_v5 = vld [vmem:[%s1039_s2 + $0x20] sm:$0xff]   ;;  %v849_v7 = vld [vmem:[%s1039_s2 + $0x28] sm:$0xff]   ;;  %v853_v11 = vld [vmem:[%s1039_s2 + $0x38] sm:$0xff]  }
   0x4   :  { %734 = vmatprep.subr.bf16.mxu0 %v860_v0  ;;  %742 = vmatprep.subr.bf16.mxu1 %v860_v0  ;;  %v848_v6 = vld [vmem:[%s1039_s2] sm:$0xff]   ;;  %v850_v8 = vld [vmem:[%s1039_s2 + $0x8] sm:$0xff]   ;;  %v854_v12 = vld [vmem:[%s1039_s2 + $0x18] sm:$0xff]  }
   0x5   :  { %v856_v23 = vld [vmem:[%s1039_s2 + $0x40] sm:$0xff]   ;;  %v855_v24 = vld [vmem:[%s1038_s1 + $0x10] sm:$0xff]   ;;  %v857_v25 = vld [vmem:[%s1039_s2 + $0x48] sm:$0xff]  }
   0x6   :  { %v858_v26 = vld [vmem:[%s1039_s2 + $0x50] sm:$0xff]   ;;  %v859_v27 = vld [vmem:[%s1039_s2 + $0x58] sm:$0xff]   ;;  %v443_v28 = vld [vmem:[%s1040_s4] sm:$0xff] }
   0x7   :  { %735 = vmatpush3.bf16.msra.mxu0 %v844_v2  ;;  %743 = vmatpush3.bf16.msra.mxu1 %v844_v2  ;;  %v444_v29 = vld [vmem:[%s1040_s4 + $0x8] sm:$0xff]  ;;  %v445_v30 = vld [vmem:[%s1040_s4 + $0x10] sm:$0xff]  ;;  %v446_v32 = vld [vmem:[%s1040_s4 + $0x18] sm:$0xff] }
   0x8   :  { %748 = vmatprep.subr.bf16.mxu0 %v860_v0  ;;  %760 = vmatprep.subr.bf16.mxu1 %v860_v0  ;;  %v821_v31 = vpack.c.bf16 %v444_v29, %v443_v28  ;;  %v825_v33 = vpack.c.bf16 %v446_v32, %v445_v30  ;;  %v447_v49 = vld [vmem:[%s1040_s4 + $0x20] sm:$0xff]  ;;  %v448_v50 = vld [vmem:[%s1040_s4 + $0x28] sm:$0xff]  ;;  %v449_v52 = vld [vmem:[%s1040_s4 + $0x30] sm:$0xff] }
   0x9   :  { %v829_v51 = vpack.c.bf16 %v448_v50, %v447_v49  ;;  %v450_v53 = vld [vmem:[%s1040_s4 + $0x38] sm:$0xff]  ;;  %v685_v56 = vld [vmem:[%s1041_s3] ss:$0 sm:$0xff] }
   0xa   :  { %737 = vmatmul.mubr.msk.bf16.vlgmr.msra.gmra.mrb[0].mxu0 %vm47_vm1, %v845_v3  ;;  %745 = vmatmul.mubr.msk.bf16.vlgmr.msra.gmra.mrb[0].mxu1 %vm47_vm1, %v846_v4  ;;  %v833_v54 = vpack.c.bf16 %v450_v53, %v449_v52 }
   0xb   :  { %749 = vmatpush3.bf16.msra.mxu0 %v847_v5  ;;  %761 = vmatpush3.bf16.msra.mxu1 %v848_v6  ;;  %v533_v6 = vld [vmem:[%s1042_s5 + $0x8] sm:$0xff] }
   0xc   :  { %750 = vmatprep.subr.bf16.mxu0 %v860_v0  ;;  %762 = vmatprep.subr.bf16.mxu1 %v860_v0 }
   0xd   :  { %756 = vmatprep.mubr.msk.bf16.mxu0 %vm861_vm0, %v860_v0  ;;  %768 = vmatprep.mubr.msk.bf16.mxu1 %vm861_vm0, %v860_v0 }
   0xf   :  { %751 = vmatpush3.bf16.msra.mxu0 %v849_v7  ;;  %763 = vmatpush3.bf16.msra.mxu1 %v850_v8  ;;  %v534_v7 = vld [vmem:[%s1042_s5 + $0x10] sm:$0xff]  ;;  %v535_v8 = vld [vmem:[%s1042_s5 + $0x18] sm:$0xff] }
  0x10   :  { %752 = vmatprep.subr.bf16.mxu0 %v860_v0  ;;  %764 = vmatprep.subr.bf16.mxu1 %v860_v0 }
  0x13   :  { %753 = vmatpush3.bf16.msra.mxu0 %v851_v9  ;;  %765 = vmatpush3.bf16.msra.mxu1 %v852_v10 }
  0x14   :  { %754 = vmatprep.subr.bf16.mxu0 %v860_v0  ;;  %766 = vmatprep.subr.bf16.mxu1 %v860_v0 }
  0x17   :  { %755 = vmatpush3.bf16.msra.mxu0 %v853_v11  ;;  %767 = vmatpush3.bf16.msra.mxu1 %v854_v12 }
  0x18   :  { %772 = vmatprep.subr.bf16.mxu0 %v860_v0  ;;  %780 = vmatprep.subr.bf16.mxu1 %v860_v0 }
  0xdd   :  { %v85_v13 = vpop.f32.mrb[0].mxu0  ;;  %v146_v14 = vpop.f32.mrb[0].mxu1 }
  0xde   :  { %v738_v15 = vpop.f32.mrb[1].mxu0  ;;  %v746_v16 = vpop.f32.mrb[1].mxu1 }
  0xdf   :  { %v88_v17 = vpop.f32.mrb[2].mxu0  ;;  %v149_v18 = vpop.f32.mrb[2].mxu1 }
  0xe0   :  { %v92_v19 = vpack.c.bf16 %v88_v17, %v85_v13  ;;  %v153_v20 = vpack.c.bf16 %v149_v18, %v146_v14  ;;  %v747_v21 = vpop.f32.mrb[3].mxu1  ;;  %v739_v22 = vpop.f32.mrb[3].mxu0 }
  0xe2   :  { %757 = vmatmul.mubr.msk.bf16.vlgmr.msra.gmra.mrb[4].mxu0 %vm187_vm2, %v153_v20  ;;  %769 = vmatmul.mubr.msk.bf16.vlgmr.msra.gmra.mrb[4].mxu1 %vm187_vm2, %v92_v19 }
  0xe3   :  { %773 = vmatpush3.bf16.msra.mxu0 %v843_v1  ;;  %776 = vmatprep.mubr.msk.bf16.mxu0 %vm861_vm0, %v860_v0 }
  0xe4   :  { %774 = vmatprep.subr.bf16.mxu0 %v860_v0  ;;  %781 = vmatpush3.bf16.msra.mxu1 %v856_v23 }
  0xe5   :  { %782 = vmatprep.subr.bf16.mxu1 %v860_v0  ;;  %788 = vmatprep.mubr.msk.bf16.mxu1 %vm861_vm0, %v860_v0 }
  0xe7   :  { %775 = vmatpush3.bf16.msra.mxu0 %v844_v2  ;;  %v532_v2 = vld [vmem:[%s1042_s5] sm:$0xff] }
  0xe8   :  { %783 = vmatpush3.bf16.msra.mxu1 %v857_v25  ;;  %822 = vmatprep.subr.bf16.mxu0 %v821_v31 }
  0xe9   :  { %784 = vmatprep.subr.bf16.mxu1 %v860_v0 }
  0xea   :  { %777 = vmatmul.mubr.msk.bf16.vlgmr.msra.gmra.mrb[8].mxu0 %vm47_vm1, %v855_v24 }
  0xeb   :  { %824 = vmatpush3.bf16.msra.mxu0 %v821_v31 }
  0xec   :  { %785 = vmatpush3.bf16.msra.mxu1 %v858_v26  ;;  %826 = vmatprep.subr.bf16.mxu0 %v825_v33 }
  0xed   :  { %786 = vmatprep.subr.bf16.mxu1 %v860_v0 }
  0xef   :  { %828 = vmatpush3.bf16.msra.mxu0 %v825_v33 }
  0xf0   :  { %787 = vmatpush3.bf16.msra.mxu1 %v859_v27  ;;  %830 = vmatprep.subr.bf16.mxu0 %v829_v51 }
  0xf3   :  { %832 = vmatpush3.bf16.msra.mxu0 %v829_v51 }
  0xf4   :  { %834 = vmatprep.subr.bf16.mxu0 %v833_v54 }
  0xf7   :  { %836 = vmatpush3.bf16.msra.mxu0 %v833_v54 }
 0x1b5   :  { %v225_v34 = vpop.f32.mrb[4].mxu0  ;;  %v293_v35 = vpop.f32.mrb[4].mxu1 }
 0x1b6   :  { %v294_v36 = vadd.f32 %v293_v35, %v225_v34  ;;  %v758_v37 = vpop.f32.mrb[5].mxu0  ;;  %v770_v38 = vpop.f32.mrb[5].mxu1 }
 0x1b7   :  { %v228_v39 = vpop.f32.mrb[6].mxu0  ;;  %v296_v40 = vpop.f32.mrb[6].mxu1 }
 0x1b8   :  { %v297_v41 = vadd.f32 %v296_v40, %v228_v39  ;;  %v759_v42 = vpop.f32.mrb[7].mxu0  ;;  %v771_v43 = vpop.f32.mrb[7].mxu1 }
 0x1bd   :  { %v345_v44 = vpop.f32.mrb[8].mxu0 }
 0x1be   :  { %v778_v45 = vpop.f32.mrb[9].mxu0 }
 0x1bf   :  { %v348_v46 = vpop.f32.mrb[10].mxu0 }
 0x1c0   :  { %v352_v47 = vpack.c.bf16 %v348_v46, %v345_v44  ;;  %v779_v48 = vpop.f32.mrb[11].mxu0 }
 0x1c2   :  { %789 = vmatmul.mubr.msk.bf16.vlgmr.msra.gmra.mrb[8].mxu1 %vm187_vm2, %v352_v47 }
 0x1c3   :  { %815 = vmatprep.mubr.msk.f32.mxu1 %vm536_vm3, %v532_v2 }
 0x295   :  { %v423_v55 = vpop.f32.mrb[8].mxu1 }
 0x296   :  { %v430_v57 = vadd.f32 %v423_v55, %v294_v36  ;;  %v790_v58 = vpop.f32.mrb[9].mxu1 }
 0x297   :  { %v426_v59 = vpop.f32.mrb[10].mxu1 }
 0x298   :  { %v439_v60 = vadd.f32 %v685_v56, %v430_v57  ;;  %v431_v61 = vadd.f32 %v426_v59, %v297_v41  ;;  %v791_v62 = vpop.f32.mrb[11].mxu1 }
 0x29a   :  { %v441_v63 = vmax.f32 %v439_v60, 0.0  ;;  %v440_v0 = vadd.f32 %v685_v56, %v431_v61 }
 0x29c   :  { %v442_v1 = vmax.f32 %v440_v0, 0.0  ;;  %808 = vmatprep.mubr.msk.f32.mxu0 %vm187_vm2, %v441_v63 }
 0x29e   :  { %809 = vmatmul.mubr.msk.f32.vlgmr.msra.gmra.mrb[12].mxu0 %vm187_vm2, %v442_v1 }
 0x371   :  { %v810_v3 = vpop.f32.mrb[12].mxu0 }
 0x372   :  { %v523_v4 = vpop.f32.mrb[13].mxu0 }
 0x373   :  { %v837_v5 = vpack.c.bf16 %v810_v3, %v523_v4 }
 0x375   :  { %838 = vmatprep.subr.bf16.mxu1 %v837_v5 }
 0x376   :  { %840 = vmatpush3.bf16.msra.mxu1 %v837_v5 }
 0x379   :  { %816 = vmatmul.mubr.msk.f32.vlgmr.msra.gmra.mrb[12].mxu1 %vm536_vm3, %v533_v6 }
 0x37a   :  { %818 = vmatprep.mubr.msk.f32.mxu1 %vm536_vm3, %v534_v7 }
 0x37d   :  { %819 = vmatmul.mubr.msk.f32.gmra.mrb[14].mxu1 %vm536_vm3, %v535_v8 }
 0x44c   :  { %v817_v9 = vpop.f32.mrb[12].mxu1 }
 0x44d   :  { %635 = vst [vmem:[%s1043_s6 + $0x8] sm:$0xff] %v817_v9  ;;  %v615_v10 = vpop.f32.mrb[13].mxu1 }
 0x44e   :  { %634 = vst [vmem:[%s1043_s6] sm:$0xff] %v615_v10 }
 0x450   :  { %v820_v11 = vpop.f32.mrb[14].mxu1 }
 0x451   :  { %637 = vst [vmem:[%s1043_s6 + $0x18] sm:$0xff] %v820_v11  ;;  %v625_v12 = vpop.f32.mrb[15].mxu1 }
 0x452   :  { %636 = vst [vmem:[%s1043_s6 + $0x10] sm:$0xff] %v625_v12 }

</bundles_post_ra>
